<compile_context>
chip_gen: v6e
topology: v6e:2x2x1
jax: 0.10.0
libtpu: 0.0.40
codegen_flags: <defaults>
</compile_context>

<pallas_src>
import math

import jax
import jax.numpy as jnp
from jax import lax
from jax.experimental import pallas as pl
from jax.experimental.pallas import tpu as pltpu


def _round_up(x, m):
    return ((x + m - 1) // m) * m


def _gelu_exact(x):
    # torch.nn.GELU() default: 0.5 * x * (1 + erf(x / sqrt(2)))
    return 0.5 * x * (1.0 + lax.erf(x * (1.0 / math.sqrt(2.0))))


def _make_mlp_kernel(use_acc_scratch):
    """Build the fused MLP kernel body.

    Grid = (row tiles 'parallel', hidden tiles 'arbitrary').  Partials of the
    second matmul accumulate across the hidden axis either directly in the
    resident f32 output block (use_acc_scratch=False) or in an f32 VMEM
    scratch accumulator (use_acc_scratch=True, for non-f32 output dtypes).
    """

    def kernel(x_ref, w1_ref, b1_ref, w2_ref, b2_ref, o_ref, *scratch):
        # x_ref:  (tm, E)   compute dtype (bf16 or f32)
        # w1_ref: (E, th)   compute dtype
        # b1_ref: (1, th)   f32
        # w2_ref: (th, E)   compute dtype
        # b2_ref: (1, E)    f32
        # o_ref:  (tm, E)   output dtype (resident across the H axis)
        h_idx = pl.program_id(1)
        acc_ref = scratch[0] if use_acc_scratch else o_ref

        # dense_1 partial block for this hidden tile (f32 MXU accumulation).
        h = jnp.dot(x_ref[...], w1_ref[...], preferred_element_type=jnp.float32)
        # Exact erf GELU in f32 — matches torch.nn.GELU default numerics.
        # TODO(synk): on v6e/v7x a bf16 bias+GELU or EUP tanh-approx would free
        # the VALU slot; kept f32/erf to preserve the reference numerics.
        h = _gelu_exact(h + b1_ref[...])
        partial = jnp.dot(h.astype(w2_ref.dtype), w2_ref[...],
                          preferred_element_type=jnp.float32)

        @pl.when(h_idx == 0)
        def _first():
            # Fold dense_2's bias into the first partial: removes one (tm, E)
            # zero-init store and the finalize bias-add.
            acc_ref[...] = partial + b2_ref[...]

        @pl.when(h_idx > 0)
        def _accumulate():
            acc_ref[...] += partial

        if use_acc_scratch:
            @pl.when(h_idx == pl.num_programs(1) - 1)
            def _finalize():
                o_ref[...] = acc_ref[...].astype(o_ref.dtype)

    return kernel


def _estimate_vmem_bytes(tm, th, E, compute_itemsize, out_itemsize, use_acc):
    """Estimated VMEM footprint for one grid step (double-buffered blocks)."""
    streamed = 2 * (tm * E * compute_itemsize          # x row tile
                    + E * th * compute_itemsize        # W1 tile
                    + th * E * compute_itemsize        # W2 tile
                    + 8 * th * 4 + 8 * E * 4           # b1 / b2 (sublane-padded f32)
                    + tm * E * out_itemsize)           # output tile
    # Compiler-managed intermediates: (tm, th) f32 hidden block + its cast to
    # the matmul input dtype for dense_2.
    intermediates = tm * th * 4 + tm * th * compute_itemsize
    acc = tm * E * 4 if use_acc else 0
    return streamed + intermediates + acc


def mlp_forward(x, w1, b1, w2, b2, *, tm=512, th=1024,
                compute_dtype=jnp.bfloat16):
    """gelu(x @ w1 + b1) @ w2 + b2.  x: (B, S, E); weights (in, out) layout.

    Dropout is a no-op (eval-mode semantics).  Returns (B, S, E) in x.dtype.
    """
    B, S, E = x.shape
    H = w1.shape[1]
    M = B * S

    out_dtype = x.dtype
    use_acc = jnp.dtype(out_dtype) != jnp.dtype(jnp.float32)
    ci = jnp.dtype(compute_dtype).itemsize
    oi = jnp.dtype(out_dtype).itemsize

    # Row tiles follow the native packed tile: (16,128) for bf16, (8,128) f32.
    row_mult = 16 if ci < 4 else 8

    # --- generation-aware VMEM budget (64 MiB/TC on v7x, 128 MiB v5e/v6e) ---
    try:
        vmem_phys = int(pltpu.get_tpu_info().vmem_capacity_bytes)
    except Exception:
        vmem_phys = 128 * 2**20
    vmem_cap = max(int(0.75 * vmem_phys), 32 * 2**20)

    # --- effective tile sizes, shrunk until the footprint fits the cap ---
    tm_req = max(tm, row_mult)
    th_req = max(th, 256)
    tm_eff = th_eff = None
    est = 0
    for _ in range(32):
        tm_eff = min(_round_up(tm_req, row_mult), _round_up(M, row_mult))
        th_eff = H if th_req >= H else min(_round_up(th_req, 256), H)
        est = _estimate_vmem_bytes(tm_eff, th_eff, E, ci, oi, use_acc)
        if est <= vmem_cap or (tm_req <= 128 and th_req <= 256):
            break
        if th_req > 1024:
            th_req //= 2            # trim hidden tile first (keeps weight reuse)
        elif tm_req > 256:
            tm_req //= 2            # then the row tile
        elif th_req > 256:
            th_req //= 2
        else:
            tm_req //= 2

    M_pad = _round_up(M, tm_eff)
    H_pad = _round_up(H, th_eff)

    # --- cast / pad operands (zero-padding the hidden dim is numerically
    #     exact: gelu(0)=0 contributes nothing through zero W2 rows) ---
    x2 = x.reshape(M, E).astype(compute_dtype)
    if M_pad != M:
        x2 = jnp.pad(x2, ((0, M_pad - M), (0, 0)))
    w1c = w1.astype(compute_dtype)
    w2c = w2.astype(compute_dtype)
    b1f = b1.astype(jnp.float32)
    if H_pad != H:
        w1c = jnp.pad(w1c, ((0, 0), (0, H_pad - H)))
        w2c = jnp.pad(w2c, ((0, H_pad - H), (0, 0)))
        b1f = jnp.pad(b1f, (0, H_pad - H))
    b1f = b1f.reshape(1, H_pad)
    b2f = b2.astype(jnp.float32).reshape(1, E)

    grid = (M_pad // tm_eff, H_pad // th_eff)
    n_row_tiles = grid[0]

    # Never request more scoped VMEM than the generation-aware cap allows.
    vmem_limit = int(min(vmem_cap, max(est + (4 << 20), 32 * 2**20)))

    cost = pl.CostEstimate(
        flops=4 * M_pad * E * H_pad,                      # two matmuls
        transcendentals=M_pad * H_pad,                    # erf per hidden elem
        bytes_accessed=(M_pad * E * (ci + oi)             # x in + out
                        + n_row_tiles * 2 * E * H_pad * ci  # re-streamed W1/W2
                        + H_pad * 4 + E * 4),             # biases
    )

    scratch = [pltpu.VMEM((tm_eff, E), jnp.float32)] if use_acc else []

    out = pl.pallas_call(
        _make_mlp_kernel(use_acc),
        out_shape=jax.ShapeDtypeStruct((M_pad, E), out_dtype),
        grid_spec=pltpu.PrefetchScalarGridSpec(
            num_scalar_prefetch=0,
            grid=grid,
            in_specs=[
                pl.BlockSpec((tm_eff, E), lambda i, h: (i, 0)),    # x rows
                pl.BlockSpec((E, th_eff), lambda i, h: (0, h)),    # W1 over H
                pl.BlockSpec((1, th_eff), lambda i, h: (0, h)),    # b1 over H
                pl.BlockSpec((th_eff, E), lambda i, h: (h, 0)),    # W2 over H
                pl.BlockSpec((1, E), lambda i, h: (0, 0)),         # b2 constant
            ],
            out_specs=pl.BlockSpec((tm_eff, E), lambda i, h: (i, 0)),
            scratch_shapes=scratch,
        ),
        compiler_params=pltpu.CompilerParams(
            # Row axis is independent (megacore-shardable on v7x); the H axis
            # carries the resident accumulator so it must be 'arbitrary'.
            dimension_semantics=("parallel", "arbitrary"),
            vmem_limit_bytes=vmem_limit,
        ),
        cost_estimate=cost,
    )(x2, w1c, b1f, w2c, b2f)

    return out[:M].reshape(B, S, E)


def init_mlp_params(key, embed_size, forward_expansion):
    """Deterministic init matching PyTorch nn.Linear's U(-1/sqrt(fan_in), 1/sqrt(fan_in))."""
    hidden = forward_expansion * embed_size
    k1, k2, k3, k4 = jax.random.split(key, 4)
    lim1 = 1.0 / math.sqrt(embed_size)
    lim2 = 1.0 / math.sqrt(hidden)
    # stored as (in_features, out_features) for x @ W
    w1 = jax.random.uniform(k1, (embed_size, hidden), jnp.float32, -lim1, lim1)
    b1 = jax.random.uniform(k2, (hidden,), jnp.float32, -lim1, lim1)
    w2 = jax.random.uniform(k3, (hidden, embed_size), jnp.float32, -lim2, lim2)
    b2 = jax.random.uniform(k4, (embed_size,), jnp.float32, -lim2, lim2)
    return w1, b1, w2, b2


if __name__ == "__main__":
    # Small, lane-friendly shapes consistent with the module's forward:
    batch, seq, embed_size, forward_expansion, dropout = 2, 8, 128, 4, 0.1

    key = jax.random.PRNGKey(0)
    kx, kp = jax.random.split(key)
    x = jax.random.normal(kx, (batch, seq, embed_size), jnp.float32)
    w1, b1, w2, b2 = init_mlp_params(kp, embed_size, forward_expansion)

    # Plain-JAX reference (dropout is identity in eval mode).
    ref = _gelu_exact(x @ w1 + b1) @ w2 + b2

    # f32 compute path — tight tolerance (exercises the no-scratch f32-out path).
    out_f32 = jax.block_until_ready(
        mlp_forward(x, w1, b1, w2, b2, compute_dtype=jnp.float32))
    assert out_f32.shape == (batch, seq, embed_size)
    assert jnp.allclose(out_f32, ref, atol=1e-3, rtol=1e-3)

    # Default bf16 matmul-input path (f32 accumulation) — looser tolerance.
    out_bf16 = jax.block_until_ready(mlp_forward(x, w1, b1, w2, b2))
    assert out_bf16.shape == (batch, seq, embed_size)
    assert jnp.allclose(out_bf16, ref, atol=5e-2, rtol=5e-2)

    # bf16 activations + bf16 output (exercises the acc-scratch finalize path).
    out_b = jax.block_until_ready(
        mlp_forward(x.astype(jnp.bfloat16), w1, b1, w2, b2))
    assert out_b.dtype == jnp.bfloat16
    assert jnp.allclose(out_b.astype(jnp.float32), ref, atol=2e-1, rtol=2e-1)

    # Ragged token count exercises the padded last row tile (no divisibility assert).
    x_ragged = x[:, :7, :]
    ref_r = _gelu_exact(x_ragged @ w1 + b1) @ w2 + b2
    out_r = jax.block_until_ready(
        mlp_forward(x_ragged, w1, b1, w2, b2, compute_dtype=jnp.float32))
    assert out_r.shape == x_ragged.shape
    assert jnp.allclose(out_r, ref_r, atol=1e-3, rtol=1e-3)

    print("KERNEL_OK")
</pallas_src>

<mosaic_0001>
module attributes {stable_mosaic.version = 11 : i64} {
  func.func @kernel(%arg0: i32, %arg1: i32, %arg2: memref<16x128xf32, #tpu.memory_space<vmem>>, %arg3: memref<128x512xf32, #tpu.memory_space<vmem>>, %arg4: memref<1x512xf32, #tpu.memory_space<vmem>>, %arg5: memref<512x128xf32, #tpu.memory_space<vmem>>, %arg6: memref<1x128xf32, #tpu.memory_space<vmem>>, %arg7: memref<16x128xf32, #tpu.memory_space<vmem>>) attributes {dimension_semantics = [#tpu.dimension_semantics<parallel>, #tpu.dimension_semantics<arbitrary>], iteration_bounds = array<i64: 1, 1>, scalar_prefetch = 0 : i64, scratch_operands = 0 : i64, tpu.core_type = #tpu.core_type<tc>, window_params = [{transform_indices = @transform_0, window_bounds = array<i64: 16, 128>}, {transform_indices = @transform_1, window_bounds = array<i64: 128, 512>}, {transform_indices = @transform_2, window_bounds = array<i64: 1, 512>}, {transform_indices = @transform_3, window_bounds = array<i64: 512, 128>}, {pipeline_mode = #tpu.pipeline_mode<synchronous>, transform_indices = @transform_4, window_bounds = array<i64: 1, 128>}, {transform_indices = @transform_5, window_bounds = array<i64: 16, 128>}]} {
    %c0 = arith.constant 0 : index
    %c0_0 = arith.constant 0 : index
    %0 = vector.load %arg2[%c0, %c0_0] : memref<16x128xf32, #tpu.memory_space<vmem>>, vector<16x128xf32>
    %c0_1 = arith.constant 0 : index
    %c0_2 = arith.constant 0 : index
    %1 = vector.load %arg3[%c0_1, %c0_2] : memref<128x512xf32, #tpu.memory_space<vmem>>, vector<128x512xf32>
    %cst = arith.constant dense<0.000000e+00> : vector<16x512xf32>
    %2 = tpu.matmul %0, %1, %cst {dimension_numbers = #tpu.dot_dimension_numbers<[1], [0], [0], [1], [0, 0, 1, 1], [], []>} : vector<16x128xf32>, vector<128x512xf32>, vector<16x512xf32> -> vector<16x512xf32>
    %c0_3 = arith.constant 0 : index
    %c0_4 = arith.constant 0 : index
    %3 = vector.load %arg4[%c0_3, %c0_4] : memref<1x512xf32, #tpu.memory_space<vmem>>, vector<1x512xf32>
    %4 = vector.broadcast %3 : vector<1x512xf32> to vector<16x512xf32>
    %5 = arith.addf %2, %4 : vector<16x512xf32>
    %cst_5 = arith.constant 5.000000e-01 : f32
    %6 = vector.broadcast %cst_5 : f32 to vector<16x512xf32>
    %7 = arith.mulf %6, %5 : vector<16x512xf32>
    %cst_6 = arith.constant 0.707106769 : f32
    %8 = vector.broadcast %cst_6 : f32 to vector<16x512xf32>
    %9 = arith.mulf %5, %8 : vector<16x512xf32>
    %10 = math.erf %9 : vector<16x512xf32>
    %cst_7 = arith.constant 1.000000e+00 : f32
    %11 = vector.broadcast %cst_7 : f32 to vector<16x512xf32>
    %12 = arith.addf %11, %10 : vector<16x512xf32>
    %13 = arith.mulf %7, %12 : vector<16x512xf32>
    %c0_8 = arith.constant 0 : index
    %c0_9 = arith.constant 0 : index
    %14 = vector.load %arg5[%c0_8, %c0_9] : memref<512x128xf32, #tpu.memory_space<vmem>>, vector<512x128xf32>
    %cst_10 = arith.constant dense<0.000000e+00> : vector<16x128xf32>
    %15 = tpu.matmul %13, %14, %cst_10 {dimension_numbers = #tpu.dot_dimension_numbers<[1], [0], [0], [1], [0, 0, 1, 1], [], []>} : vector<16x512xf32>, vector<512x128xf32>, vector<16x128xf32> -> vector<16x128xf32>
    %c0_i32 = arith.constant 0 : i32
    %16 = arith.cmpi eq, %arg1, %c0_i32 : i32
    %17 = arith.extui %16 : i1 to i32
    %c0_i32_11 = arith.constant 0 : i32
    %18 = arith.cmpi ne, %17, %c0_i32_11 : i32
    scf.if %18 {
      %c0_14 = arith.constant 0 : index
      %c0_15 = arith.constant 0 : index
      %22 = vector.load %arg6[%c0_14, %c0_15] : memref<1x128xf32, #tpu.memory_space<vmem>>, vector<1x128xf32>
      %23 = vector.broadcast %22 : vector<1x128xf32> to vector<16x128xf32>
      %24 = arith.addf %15, %23 : vector<16x128xf32>
      %c0_16 = arith.constant 0 : index
      %c0_17 = arith.constant 0 : index
      %25 = vector.load %arg7[%c0_16, %c0_17] : memref<16x128xf32, #tpu.memory_space<vmem>>, vector<16x128xf32>
      tpu.vector_store %arg7[%c0_16, %c0_17], %24 {strides = array<i32>} : memref<16x128xf32, #tpu.memory_space<vmem>>, vector<16x128xf32>,
    } else {
    }
    %c0_i32_12 = arith.constant 0 : i32
    %19 = arith.cmpi sgt, %arg1, %c0_i32_12 : i32
    %20 = arith.extui %19 : i1 to i32
    %c0_i32_13 = arith.constant 0 : i32
    %21 = arith.cmpi ne, %20, %c0_i32_13 : i32
    scf.if %21 {
      %c0_14 = arith.constant 0 : index
      %c0_15 = arith.constant 0 : index
      %22 = vector.load %arg7[%c0_14, %c0_15] : memref<16x128xf32, #tpu.memory_space<vmem>>, vector<16x128xf32>
      %23 = arith.addf %22, %15 : vector<16x128xf32>
      %c0_16 = arith.constant 0 : index
      %c0_17 = arith.constant 0 : index
      %24 = vector.load %arg7[%c0_16, %c0_17] : memref<16x128xf32, #tpu.memory_space<vmem>>, vector<16x128xf32>
      tpu.vector_store %arg7[%c0_16, %c0_17], %23 {strides = array<i32>} : memref<16x128xf32, #tpu.memory_space<vmem>>, vector<16x128xf32>,
    } else {
    }
    return
  }
  func.func @transform_0(%arg0: i32, %arg1: i32) -> (i32, i32) {
    %c0_i32 = arith.constant 0 : i32
    %c0_i32_0 = arith.constant 0 : i32
    return %arg0, %c0_i32 : i32, i32
  }
  func.func @transform_1(%arg0: i32, %arg1: i32) -> (i32, i32) {
    %c0_i32 = arith.constant 0 : i32
    %c0_i32_0 = arith.constant 0 : i32
    return %c0_i32, %arg1 : i32, i32
  }
  func.func @transform_2(%arg0: i32, %arg1: i32) -> (i32, i32) {
    %c0_i32 = arith.constant 0 : i32
    %c0_i32_0 = arith.constant 0 : i32
    return %c0_i32, %arg1 : i32, i32
  }
  func.func @transform_3(%arg0: i32, %arg1: i32) -> (i32, i32) {
    %c0_i32 = arith.constant 0 : i32
    %c0_i32_0 = arith.constant 0 : i32
    return %arg1, %c0_i32 : i32, i32
  }
  func.func @transform_4(%arg0: i32, %arg1: i32) -> (i32, i32) {
    %c0_i32 = arith.constant 0 : i32
    %c0_i32_0 = arith.constant 0 : i32
    %c0_i32_1 = arith.constant 0 : i32
    return %c0_i32, %c0_i32_0 : i32, i32
  }
  func.func @transform_5(%arg0: i32, %arg1: i32) -> (i32, i32) {
    %c0_i32 = arith.constant 0 : i32
    %c0_i32_0 = arith.constant 0 : i32
    return %arg0, %c0_i32 : i32, i32
  }
}

</mosaic_0001>

<bundles_post_ra>
// kernel: tpu_custom_call.1
= control target key start
LH: loop header
LB: loop body
LE: loop exit
PB: predicated region body
PF: predicated region fallthrough
CT: control target
= control target key end

     0   :  { %10 = vsyncpa [#allocation3], 0  ;;  %s896_s0 = inlined_call_operand.hbm [shape: f32[16,128], index: 0, kind: input, shape index: {}]   ;;  %s897_s1 = inlined_call_operand.hbm [shape: f32[128,512], index: 1, kind: input, shape index: {}]   ;;  %s898_s2 = inlined_call_operand.hbm [shape: f32[1,512], index: 2, kind: input, shape index: {}]   ;;  %s899_s3 = inlined_call_operand.hbm [shape: f32[512,128], index: 3, kind: input, shape index: {}]   ;;  %s900_s4 = inlined_call_operand.vmem [shape: f32[1,128], index: 4, kind: input, shape index: {}]   ;;  %s901_s5 = inlined_call_operand.hbm [shape: f32[16,128], index: 5, kind: output, shape index: {}]  }
   0x1   :  { %11 = vsyncpa [#allocation6], 0 }
   0x2   :  { %12 = vsyncpa [#allocation9], 0 }
   0x3   :  { %13 = vsyncpa [#allocation4], 0  ;;  %s825_s18 = smov [#allocation5]  }
   0x4   :  { %s31_s19 = sshll.u32 %s825_s18, 4  ;;  %s32_s19 = int_to_ptr.vmem [resolvable:$true] %s31_s19 }
   0x5   :  { %s725_s20 = scalar_lea.vmem %s32_s19, 8192  ;;  %p730_p1 = scmp.lt.s32.totalorder %s32_s19, %s32_s19 }
   0x6   :  { %p726_p0 = scmp.ne.s32.totalorder %s32_s19, %s725_s20  ;;  %p731_p2 = scmp.lt.s32.totalorder %s725_s20, %s725_s20 }
   0x8   :  { %p732_p3 = por %p731_p2, %p730_p1 }
   0xa   :  { %p733_p4 = pnand %p732_p3, %p726_p0 }
   0xc   :  { %736 = shalt.err (!%p733_p4)
}
   0xd   :  { %s826_s21 = smov 512   ;;  %s827_s22 = smov 32  }
   0xe   :  { %37 = dma.hbm_to_vmem [thread:$0]  %s897_s1, 8192, %s32_s19, [#allocation6], %s826_s21, %s826_s21, %s827_s22  }
   0xf   :  { %s828_s25 = smov [#allocation2]  }
  0x10   :  { %s19_s26 = sshll.u32 %s828_s25, 4  ;;  %s20_s26 = int_to_ptr.vmem [resolvable:$true] %s19_s26 }
  0x11   :  { %s745_s27 = scalar_lea.vmem %s20_s26, 256  ;;  %p750_p6 = scmp.lt.s32.totalorder %s20_s26, %s20_s26 }
  0x12   :  { %p746_p5 = scmp.ne.s32.totalorder %s20_s26, %s745_s27  ;;  %p751_p7 = scmp.lt.s32.totalorder %s745_s27, %s745_s27 }
  0x14   :  { %p752_p8 = por %p751_p7, %p750_p6 }
  0x16   :  { %p753_p9 = pnand %p752_p8, %p746_p5 }
  0x18   :  { %756 = shalt.err (!%p753_p9)
}
  0x19   :  { %s829_s28 = smov 128   ;;  %s830_s29 = smov 8  }
  0x1a   :  { %25 = dma.hbm_to_vmem [thread:$0]  %s896_s0, 256, %s20_s26, [#allocation3], %s829_s28, %s829_s28, %s830_s29  }
  0x1b   :  { %s831_s1 = smov [#allocation7]   ;;  %s832_s8 = smov [#allocation8]  }
  0x1c   :  { %s44_s7 = sshll.u32 %s831_s1, 4  ;;  %s53_s9 = sshll.u32 %s832_s8, 4  ;;  %s45_s7 = int_to_ptr.vmem [resolvable:$true] %s44_s7  ;;  %s54_s9 = int_to_ptr.vmem [resolvable:$true] %s53_s9 }
  0x1d   :  { %s765_s10 = scalar_lea.vmem %s45_s7, 64  ;;  %p770_p11 = scmp.lt.s32.totalorder %s45_s7, %s45_s7 }
  0x1e   :  { %p766_p10 = scmp.ne.s32.totalorder %s45_s7, %s765_s10  ;;  %p771_p12 = scmp.lt.s32.totalorder %s765_s10, %s765_s10 }
  0x20   :  { %p772_p13 = por %p771_p12, %p770_p11 }
  0x22   :  { %p773_p0 = pnand %p772_p13, %p766_p10 }
  0x24   :  { %776 = shalt.err (!%p773_p0)
}
  0x25   :  { %47 = dma.hbm_to_vmem [thread:$0]  %s898_s2, 64, %s45_s7, [#allocation6]  }
  0x26   :  { %s785_s13 = scalar_lea.vmem %s54_s9, 8192  ;;  %p790_p2 = scmp.lt.s32.totalorder %s54_s9, %s54_s9 }
  0x27   :  { %p786_p1 = scmp.ne.s32.totalorder %s54_s9, %s785_s13  ;;  %p791_p3 = scmp.lt.s32.totalorder %s785_s13, %s785_s13 }
  0x29   :  { %p792_p4 = por %p791_p3, %p790_p2 }
  0x2b   :  { %p793_p5 = pnand %p792_p4, %p786_p1 }
  0x2d   :  { %796 = shalt.err (!%p793_p5)
}
  0x2e   :  { %59 = dma.hbm_to_vmem [thread:$0]  %s899_s3, 8192, %s54_s9, [#allocation9], %s829_s28, %s829_s28, %s830_s29  }
  0x2f   :  { %817 = dma.done.wait [#allocation3], 256  }
  0x30   :  { %818 = vsyncadd [#allocation3], 4294967040 }
  0x31   :  { %819 = dma.done.wait [#allocation6], 8256  }
  0x32   :  { %820 = vsyncadd [#allocation6], 4294959040 }
  0x33   :  { %821 = dma.done.wait [#allocation9], 8192  }
  0x34   :  { %822 = vsyncadd [#allocation9], 4294959104  ;;  %v833_v0 = vmov 0.0   ;;  %v137_v1 = vld [vmem:[#allocation5 + $0x1e8] sm:$0xff]  ;;  %v139_v2 = vld [vmem:[#allocation5 + $0x1f8] sm:$0xff]  ;;  %s834_s15 = smov [#allocation10]  }
  0x35   :  { %226 = vmatprep.mubr.f32.mxu0 %v833_v0  ;;  %303 = vmatprep.mubr.f32.mxu1 %v833_v0  ;;  %v136_v3 = vld [vmem:[#allocation5 + $0x1e0] sm:$0xff]  ;;  %v138_v4 = vld [vmem:[#allocation5 + $0x1f0] sm:$0xff]  ;;  %v133_v5 = vld [vmem:[#allocation5 + $0x1c8] sm:$0xff]  ;;  %s600_s16 = sshll.u32 %s834_s15, 4  ;;  %s601_s16 = int_to_ptr.vmem [resolvable:$true] %s600_s16 }
  0x36   :  { %162 = vmatprep.subr.mxu0 %v137_v1  ;;  %239 = vmatprep.subr.mxu1 %v139_v2  ;;  %v135_v6 = vld [vmem:[#allocation5 + $0x1d8] sm:$0xff]  ;;  %v132_v7 = vld [vmem:[#allocation5 + $0x1c0] sm:$0xff]  ;;  %v134_v8 = vld [vmem:[#allocation5 + $0x1d0] sm:$0xff]  ;;  %s797_s17 = scalar_lea.vmem %s601_s16, 256  ;;  %p802_p7 = scmp.lt.s32.totalorder %s601_s16, %s601_s16 }
  0x37   :  { %163 = vmatpush1.msra.mxu0 %v136_v3  ;;  %240 = vmatpush1.msra.mxu1 %v138_v4  ;;  %v129_v9 = vld [vmem:[#allocation5 + $0x1a8] sm:$0xff]  ;;  %v131_v10 = vld [vmem:[#allocation5 + $0x1b8] sm:$0xff]  ;;  %v128_v11 = vld [vmem:[#allocation5 + $0x1a0] sm:$0xff]  ;;  %p798_p6 = scmp.ne.s32.totalorder %s601_s16, %s797_s17  ;;  %p803_p8 = scmp.lt.s32.totalorder %s797_s17, %s797_s17 }
  0x38   :  { %164 = vmatprep.subr.mxu0 %v133_v5  ;;  %241 = vmatprep.subr.mxu1 %v135_v6  ;;  %v130_v12 = vld [vmem:[#allocation5 + $0x1b0] sm:$0xff]  ;;  %v125_v13 = vld [vmem:[#allocation5 + $0x188] sm:$0xff]  ;;  %v127_v14 = vld [vmem:[#allocation5 + $0x198] sm:$0xff] }
  0x39   :  { %165 = vmatpush1.msra.mxu0 %v132_v7  ;;  %242 = vmatpush1.msra.mxu1 %v134_v8  ;;  %v124_v15 = vld [vmem:[#allocation5 + $0x180] sm:$0xff]  ;;  %v126_v16 = vld [vmem:[#allocation5 + $0x190] sm:$0xff]  ;;  %v121_v17 = vld [vmem:[#allocation5 + $0x168] sm:$0xff]  ;;  %p804_p9 = por %p803_p8, %p802_p7 }
  0x3a   :  { %166 = vmatprep.subr.mxu0 %v129_v9  ;;  %243 = vmatprep.subr.mxu1 %v131_v10  ;;  %v123_v18 = vld [vmem:[#allocation5 + $0x178] sm:$0xff]  ;;  %v120_v19 = vld [vmem:[#allocation5 + $0x160] sm:$0xff]  ;;  %v122_v20 = vld [vmem:[#allocation5 + $0x170] sm:$0xff] }
  0x3b   :  { %167 = vmatpush1.msra.mxu0 %v128_v11  ;;  %244 = vmatpush1.msra.mxu1 %v130_v12  ;;  %v117_v21 = vld [vmem:[#allocation5 + $0x148] sm:$0xff]  ;;  %v119_v22 = vld [vmem:[#allocation5 + $0x158] sm:$0xff]  ;;  %v116_v23 = vld [vmem:[#allocation5 + $0x140] sm:$0xff]  ;;  %p805_p10 = pnand %p804_p9, %p798_p6 }
  0x3c   :  { %168 = vmatprep.subr.mxu0 %v125_v13  ;;  %245 = vmatprep.subr.mxu1 %v127_v14  ;;  %v118_v24 = vld [vmem:[#allocation5 + $0x150] sm:$0xff]  ;;  %v113_v25 = vld [vmem:[#allocation5 + $0x128] sm:$0xff]  ;;  %v115_v26 = vld [vmem:[#allocation5 + $0x138] sm:$0xff] }
  0x3d   :  { %169 = vmatpush1.msra.mxu0 %v124_v15  ;;  %246 = vmatpush1.msra.mxu1 %v126_v16  ;;  %v112_v27 = vld [vmem:[#allocation5 + $0x120] sm:$0xff]  ;;  %v114_v28 = vld [vmem:[#allocation5 + $0x130] sm:$0xff]  ;;  %v109_v29 = vld [vmem:[#allocation5 + $0x108] sm:$0xff] }
  0x3e   :  { %170 = vmatprep.subr.mxu0 %v121_v17  ;;  %247 = vmatprep.subr.mxu1 %v123_v18  ;;  %v111_v30 = vld [vmem:[#allocation5 + $0x118] sm:$0xff]  ;;  %v108_v31 = vld [vmem:[#allocation5 + $0x100] sm:$0xff]  ;;  %v110_v32 = vld [vmem:[#allocation5 + $0x110] sm:$0xff] }
  0x3f   :  { %171 = vmatpush1.msra.mxu0 %v120_v19  ;;  %248 = vmatpush1.msra.mxu1 %v122_v20  ;;  %v105_v33 = vld [vmem:[#allocation5 + $0xe8] sm:$0xff]  ;;  %v107_v34 = vld [vmem:[#allocation5 + $0xf8] sm:$0xff]  ;;  %v104_v35 = vld [vmem:[#allocation5 + $0xe0] sm:$0xff] }
  0x40   :  { %172 = vmatprep.subr.mxu0 %v117_v21  ;;  %249 = vmatprep.subr.mxu1 %v119_v22  ;;  %v106_v36 = vld [vmem:[#allocation5 + $0xf0] sm:$0xff]  ;;  %v101_v37 = vld [vmem:[#allocation5 + $0xc8] sm:$0xff]  ;;  %v103_v38 = vld [vmem:[#allocation5 + $0xd8] sm:$0xff] }
  0x41   :  { %173 = vmatpush1.msra.mxu0 %v116_v23  ;;  %250 = vmatpush1.msra.mxu1 %v118_v24  ;;  %v100_v39 = vld [vmem:[#allocation5 + $0xc0] sm:$0xff]  ;;  %v102_v40 = vld [vmem:[#allocation5 + $0xd0] sm:$0xff]  ;;  %v97_v41 = vld [vmem:[#allocation5 + $0xa8] sm:$0xff] }
  0x42   :  { %174 = vmatprep.subr.mxu0 %v113_v25  ;;  %251 = vmatprep.subr.mxu1 %v115_v26  ;;  %v99_v42 = vld [vmem:[#allocation5 + $0xb8] sm:$0xff]  ;;  %v96_v43 = vld [vmem:[#allocation5 + $0xa0] sm:$0xff]  ;;  %v98_v44 = vld [vmem:[#allocation5 + $0xb0] sm:$0xff] }
  0x43   :  { %175 = vmatpush1.msra.mxu0 %v112_v27  ;;  %252 = vmatpush1.msra.mxu1 %v114_v28  ;;  %v93_v45 = vld [vmem:[#allocation5 + $0x88] sm:$0xff]  ;;  %v95_v46 = vld [vmem:[#allocation5 + $0x98] sm:$0xff]  ;;  %v92_v47 = vld [vmem:[#allocation5 + $0x80] sm:$0xff] }
  0x44   :  { %176 = vmatprep.subr.mxu0 %v109_v29  ;;  %253 = vmatprep.subr.mxu1 %v111_v30  ;;  %v94_v48 = vld [vmem:[#allocation5 + $0x90] sm:$0xff]  ;;  %v89_v49 = vld [vmem:[#allocation5 + $0x68] sm:$0xff]  ;;  %v91_v50 = vld [vmem:[#allocation5 + $0x78] sm:$0xff] }
  0x45   :  { %177 = vmatpush1.msra.mxu0 %v108_v31  ;;  %254 = vmatpush1.msra.mxu1 %v110_v32  ;;  %v88_v51 = vld [vmem:[#allocation5 + $0x60] sm:$0xff]  ;;  %v90_v52 = vld [vmem:[#allocation5 + $0x70] sm:$0xff]  ;;  %v85_v53 = vld [vmem:[#allocation5 + $0x48] sm:$0xff] }
  0x46   :  { %178 = vmatprep.subr.mxu0 %v105_v33  ;;  %255 = vmatprep.subr.mxu1 %v107_v34  ;;  %v87_v54 = vld [vmem:[#allocation5 + $0x58] sm:$0xff]  ;;  %v84_v55 = vld [vmem:[#allocation5 + $0x40] sm:$0xff]  ;;  %v86_v56 = vld [vmem:[#allocation5 + $0x50] sm:$0xff] }
  0x47   :  { %179 = vmatpush1.msra.mxu0 %v104_v35  ;;  %256 = vmatpush1.msra.mxu1 %v106_v36  ;;  %v81_v57 = vld [vmem:[#allocation5 + $0x28] sm:$0xff]  ;;  %v83_v58 = vld [vmem:[#allocation5 + $0x38] sm:$0xff]  ;;  %v80_v59 = vld [vmem:[#allocation5 + $0x20] sm:$0xff] }
  0x48   :  { %180 = vmatprep.subr.mxu0 %v101_v37  ;;  %257 = vmatprep.subr.mxu1 %v103_v38  ;;  %v82_v60 = vld [vmem:[#allocation5 + $0x30] sm:$0xff]  ;;  %v77_v61 = vld [vmem:[#allocation5 + $0x8] sm:$0xff]  ;;  %v79_v62 = vld [vmem:[#allocation5 + $0x18] sm:$0xff] }
  0x49   :  { %181 = vmatpush1.msra.mxu0 %v100_v39  ;;  %258 = vmatpush1.msra.mxu1 %v102_v40  ;;  %v76_v63 = vld [vmem:[#allocation5] sm:$0xff]  ;;  %v78_v1 = vld [vmem:[#allocation5 + $0x10] sm:$0xff]  ;;  %v75_v7 = vld [vmem:[#allocation2 + $0x8] sm:$0xff] }
  0x4a   :  { %182 = vmatprep.subr.mxu0 %v97_v41  ;;  %259 = vmatprep.subr.mxu1 %v99_v42  ;;  %v74_v2 = vld [vmem:[#allocation2] sm:$0xff]  ;;  %v387_v3 = vld [vmem:[#allocation8 + $0xf8] sm:$0xff]  ;;  %v416_v16 = vld [vmem:[#allocation8 + $0x1e0] sm:$0xff] }
  0x4b   :  { %183 = vmatpush1.msra.mxu0 %v96_v43  ;;  %260 = vmatpush1.msra.mxu1 %v98_v44  ;;  %v419_v4 = vld [vmem:[#allocation8 + $0x1f8] sm:$0xff]  ;;  %v386_v8 = vld [vmem:[#allocation8 + $0xf0] sm:$0xff]  ;;  %v385_v12 = vld [vmem:[#allocation8 + $0xe8] sm:$0xff] }
  0x4c   :  { %184 = vmatprep.subr.mxu0 %v93_v45  ;;  %261 = vmatprep.subr.mxu1 %v95_v46  ;;  %v371_v5 = vld [vmem:[#allocation8 + $0x78] sm:$0xff]  ;;  %v418_v9 = vld [vmem:[#allocation8 + $0x1f0] sm:$0xff]  ;;  %v417_v13 = vld [vmem:[#allocation8 + $0x1e8] sm:$0xff] }
  0x4d   :  { %185 = vmatpush1.msra.mxu0 %v92_v47  ;;  %262 = vmatpush1.msra.mxu1 %v94_v48  ;;  %v403_v6 = vld [vmem:[#allocation8 + $0x178] sm:$0xff]  ;;  %v370_v10 = vld [vmem:[#allocation8 + $0x70] sm:$0xff]  ;;  %v369_v14 = vld [vmem:[#allocation8 + $0x68] sm:$0xff] }
  0x4e   :  { %186 = vmatprep.subr.mxu0 %v89_v49  ;;  %263 = vmatprep.subr.mxu1 %v91_v50  ;;  %v402_v11 = vld [vmem:[#allocation8 + $0x170] sm:$0xff]  ;;  %v401_v15 = vld [vmem:[#allocation8 + $0x168] sm:$0xff]  ;;  %v368_v17 = vld [vmem:[#allocation8 + $0x60] sm:$0xff] }
  0x4f   :  { %187 = vmatpush1.msra.mxu0 %v88_v51  ;;  %264 = vmatpush1.msra.mxu1 %v90_v52  ;;  %v400_v18 = vld [vmem:[#allocation8 + $0x160] sm:$0xff]  ;;  %v383_v19 = vld [vmem:[#allocation8 + $0xd8] sm:$0xff]  ;;  %v382_v23 = vld [vmem:[#allocation8 + $0xd0] sm:$0xff] }
  0x50   :  { %188 = vmatprep.subr.mxu0 %v85_v53  ;;  %265 = vmatprep.subr.mxu1 %v87_v54  ;;  %v415_v20 = vld [vmem:[#allocation8 + $0x1d8] sm:$0xff]  ;;  %v414_v24 = vld [vmem:[#allocation8 + $0x1d0] sm:$0xff]  ;;  %v381_v27 = vld [vmem:[#allocation8 + $0xc8] sm:$0xff] }
  0x51   :  { %189 = vmatpush1.msra.mxu0 %v84_v55  ;;  %266 = vmatpush1.msra.mxu1 %v86_v56  ;;  %v367_v21 = vld [vmem:[#allocation8 + $0x58] sm:$0xff]  ;;  %v366_v25 = vld [vmem:[#allocation8 + $0x50] sm:$0xff]  ;;  %v413_v28 = vld [vmem:[#allocation8 + $0x1c8] sm:$0xff] }
  0x52   :  { %190 = vmatprep.subr.mxu0 %v81_v57  ;;  %267 = vmatprep.subr.mxu1 %v83_v58  ;;  %v399_v22 = vld [vmem:[#allocation8 + $0x158] sm:$0xff]  ;;  %v398_v26 = vld [vmem:[#allocation8 + $0x150] sm:$0xff]  ;;  %v365_v29 = vld [vmem:[#allocation8 + $0x48] sm:$0xff] }
  0x53   :  { %191 = vmatpush1.msra.mxu0 %v80_v59  ;;  %268 = vmatpush1.msra.mxu1 %v82_v60  ;;  %v397_v30 = vld [vmem:[#allocation8 + $0x148] sm:$0xff]  ;;  %v380_v31 = vld [vmem:[#allocation8 + $0xc0] sm:$0xff]  ;;  %v379_v35 = vld [vmem:[#allocation8 + $0xb8] sm:$0xff] }
  0x54   :  { %192 = vmatprep.subr.mxu0 %v77_v61  ;;  %269 = vmatprep.subr.mxu1 %v79_v62  ;;  %v412_v32 = vld [vmem:[#allocation8 + $0x1c0] sm:$0xff]  ;;  %v411_v36 = vld [vmem:[#allocation8 + $0x1b8] sm:$0xff]  ;;  %v378_v39 = vld [vmem:[#allocation8 + $0xb0] sm:$0xff] }
  0x55   :  { %193 = vmatpush1.msra.mxu0 %v76_v63  ;;  %270 = vmatpush1.msra.mxu1 %v78_v1  ;;  %v364_v33 = vld [vmem:[#allocation8 + $0x40] sm:$0xff]  ;;  %v363_v37 = vld [vmem:[#allocation8 + $0x38] sm:$0xff]  ;;  %v410_v40 = vld [vmem:[#allocation8 + $0x1b0] sm:$0xff] }
  0x56   :  { %227 = vmatmul.mubr.f32.vlgmr.msra.gmra.mxu0 %v74_v2  ;;  %304 = vmatmul.mubr.f32.vlgmr.msra.gmra.mxu1 %v74_v2  ;;  %v396_v34 = vld [vmem:[#allocation8 + $0x140] sm:$0xff]  ;;  %v395_v38 = vld [vmem:[#allocation8 + $0x138] sm:$0xff]  ;;  %v362_v41 = vld [vmem:[#allocation8 + $0x30] sm:$0xff] }
  0x57   :  { %232 = vmatprep.mubr.f32.mxu0 %v833_v0  ;;  %309 = vmatprep.mubr.f32.mxu1 %v833_v0  ;;  %v384_v0 = vld [vmem:[#allocation8 + $0xe0] sm:$0xff]  ;;  %v394_v42 = vld [vmem:[#allocation8 + $0x130] sm:$0xff]  ;;  %v377_v43 = vld [vmem:[#allocation8 + $0xa8] sm:$0xff] }
  0x58   :  { %615 = vmatprep.subr.mxu0 %v387_v3  ;;  %653 = vmatprep.subr.mxu1 %v419_v4  ;;  %v409_v44 = vld [vmem:[#allocation8 + $0x1a8] sm:$0xff]  ;;  %v376_v47 = vld [vmem:[#allocation8 + $0xa0] sm:$0xff]  ;;  %v375_v51 = vld [vmem:[#allocation8 + $0x98] sm:$0xff]  ;;  %v142_v4 = vlaneseq }
  0x59   :  { %616 = vmatpush3.msra.mxu0 %v371_v5  ;;  %654 = vmatpush3.msra.mxu1 %v403_v6  ;;  %v361_v45 = vld [vmem:[#allocation8 + $0x28] sm:$0xff]  ;;  %v408_v48 = vld [vmem:[#allocation8 + $0x1a0] sm:$0xff]  ;;  %v407_v52 = vld [vmem:[#allocation8 + $0x198] sm:$0xff] }
  0x5a   :  { %233 = vmatmul.mubr.f32.gmra.mxu0 %v75_v7  ;;  %310 = vmatmul.mubr.f32.gmra.mxu1 %v75_v7  ;;  %v393_v46 = vld [vmem:[#allocation8 + $0x128] sm:$0xff]  ;;  %v360_v49 = vld [vmem:[#allocation8 + $0x20] sm:$0xff]  ;;  %v359_v53 = vld [vmem:[#allocation8 + $0x18] sm:$0xff]  ;;  %v143_v5 = vshrl.u32 %v142_v4, 7 }
  0x5b   :  { %617 = vmatprep.subr.mxu0 %v386_v8  ;;  %655 = vmatprep.subr.mxu1 %v418_v9  ;;  %v392_v50 = vld [vmem:[#allocation8 + $0x120] sm:$0xff]  ;;  %v391_v54 = vld [vmem:[#allocation8 + $0x118] sm:$0xff]  ;;  %v374_v55 = vld [vmem:[#allocation8 + $0x90] sm:$0xff] }
  0x5c   :  { %618 = vmatpush3.msra.mxu0 %v370_v10  ;;  %656 = vmatpush3.msra.mxu1 %v402_v11  ;;  %v406_v56 = vld [vmem:[#allocation8 + $0x190] sm:$0xff]  ;;  %v373_v59 = vld [vmem:[#allocation8 + $0x88] sm:$0xff]  ;;  %v372_v63 = vld [vmem:[#allocation8 + $0x80] sm:$0xff]  ;;  %v144_v6 = vsub.s32 0, %v143_v5  ;;  %v152_v7 = vsub.s32 2, %v143_v5  ;;  %v148_v9 = vsub.s32 1, %v143_v5 }
  0x5d   :  { %619 = vmatprep.subr.mxu0 %v385_v12  ;;  %657 = vmatprep.subr.mxu1 %v417_v13  ;;  %v358_v57 = vld [vmem:[#allocation8 + $0x10] sm:$0xff]  ;;  %v405_v60 = vld [vmem:[#allocation8 + $0x188] sm:$0xff]  ;;  %v404_v1 = vld [vmem:[#allocation8 + $0x180] sm:$0xff]  ;;  %v156_v10 = vsub.s32 3, %v143_v5 }
  0x5e   :  { %620 = vmatpush3.msra.mxu0 %v369_v14  ;;  %658 = vmatpush3.msra.mxu1 %v401_v15  ;;  %v390_v58 = vld [vmem:[#allocation8 + $0x110] sm:$0xff]  ;;  %v357_v61 = vld [vmem:[#allocation8 + $0x8] sm:$0xff]  ;;  %v356_v2 = vld [vmem:[#allocation8] sm:$0xff] }
  0x5f   :  { %621 = vmatprep.subr.mxu0 %v384_v0  ;;  %659 = vmatprep.subr.mxu1 %v416_v16  ;;  %v389_v62 = vld [vmem:[#allocation8 + $0x108] sm:$0xff]  ;;  %v388_v3 = vld [vmem:[#allocation8 + $0x100] sm:$0xff]  ;;  %v140_v8 = vld [vmem:[#allocation7] sm:$0xf] }
  0x60   :  { %622 = vmatpush3.msra.mxu0 %v368_v17  ;;  %660 = vmatpush3.msra.mxu1 %v400_v18  ;;  %v145_v11 = vrot.slane %v140_v8, %v144_v6  ;;  %v153_v12 = vrot.slane %v140_v8, %v152_v7  ;;  %v149_v15 = vrot.slane %v140_v8, %v148_v9 }
  0x61   :  { %623 = vmatprep.subr.mxu0 %v383_v19  ;;  %661 = vmatprep.subr.mxu1 %v415_v20  ;;  %v157_v0 = vrot.slane %v140_v8, %v156_v10 }
  0x62   :  { %624 = vmatpush3.msra.mxu0 %v367_v21  ;;  %662 = vmatpush3.msra.mxu1 %v399_v22 }
  0x63   :  { %625 = vmatprep.subr.mxu0 %v382_v23  ;;  %663 = vmatprep.subr.mxu1 %v414_v24 }
  0x64   :  { %626 = vmatpush3.msra.mxu0 %v366_v25  ;;  %664 = vmatpush3.msra.mxu1 %v398_v26 }
  0x65   :  { %627 = vmatprep.subr.mxu0 %v381_v27  ;;  %665 = vmatprep.subr.mxu1 %v413_v28 }
  0x66   :  { %628 = vmatpush3.msra.mxu0 %v365_v29  ;;  %666 = vmatpush3.msra.mxu1 %v397_v30 }
  0x67   :  { %629 = vmatprep.subr.mxu0 %v380_v31  ;;  %667 = vmatprep.subr.mxu1 %v412_v32 }
  0x68   :  { %630 = vmatpush3.msra.mxu0 %v364_v33  ;;  %668 = vmatpush3.msra.mxu1 %v396_v34 }
  0x69   :  { %631 = vmatprep.subr.mxu0 %v379_v35  ;;  %669 = vmatprep.subr.mxu1 %v411_v36 }
  0x6a   :  { %632 = vmatpush3.msra.mxu0 %v363_v37  ;;  %670 = vmatpush3.msra.mxu1 %v395_v38 }
  0x6b   :  { %633 = vmatprep.subr.mxu0 %v378_v39  ;;  %671 = vmatprep.subr.mxu1 %v410_v40 }
  0x6c   :  { %634 = vmatpush3.msra.mxu0 %v362_v41  ;;  %672 = vmatpush3.msra.mxu1 %v394_v42 }
  0x6d   :  { %635 = vmatprep.subr.mxu0 %v377_v43  ;;  %673 = vmatprep.subr.mxu1 %v409_v44 }
  0x6e   :  { %636 = vmatpush3.msra.mxu0 %v361_v45  ;;  %674 = vmatpush3.msra.mxu1 %v393_v46 }
  0x6f   :  { %637 = vmatprep.subr.mxu0 %v376_v47  ;;  %675 = vmatprep.subr.mxu1 %v408_v48 }
  0x70   :  { %638 = vmatpush3.msra.mxu0 %v360_v49  ;;  %676 = vmatpush3.msra.mxu1 %v392_v50 }
  0x71   :  { %639 = vmatprep.subr.mxu0 %v375_v51  ;;  %677 = vmatprep.subr.mxu1 %v407_v52 }
  0x72   :  { %640 = vmatpush3.msra.mxu0 %v359_v53  ;;  %678 = vmatpush3.msra.mxu1 %v391_v54 }
  0x73   :  { %641 = vmatprep.subr.mxu0 %v374_v55  ;;  %679 = vmatprep.subr.mxu1 %v406_v56 }
  0x74   :  { %642 = vmatpush3.msra.mxu0 %v358_v57  ;;  %680 = vmatpush3.msra.mxu1 %v390_v58 }
  0x75   :  { %643 = vmatprep.subr.mxu0 %v373_v59  ;;  %681 = vmatprep.subr.mxu1 %v405_v60 }
  0x76   :  { %644 = vmatpush3.msra.mxu0 %v357_v61  ;;  %682 = vmatpush3.msra.mxu1 %v389_v62 }
  0x77   :  { %645 = vmatprep.subr.mxu0 %v372_v63  ;;  %683 = vmatprep.subr.mxu1 %v404_v1 }
  0x78   :  { %646 = vmatpush3.msra.mxu0 %v356_v2  ;;  %684 = vmatpush3.msra.mxu1 %v388_v3 }
 0x116   :  { %v228_v13 = vpop.f32.mrf.mxu0  ;;  %v305_v14 = vpop.f32.mrf.mxu1 }
 0x117   :  { %v229_v16 = vadd.f32 %v228_v13, %v145_v11  ;;  %v306_v17 = vadd.f32 %v305_v14, %v153_v12  ;;  %v614_v14 = vld [vmem:[%s900_s4] ss:$0 sm:$0xff] }
 0x118   :  { %v230_v18 = vpop.f32.mrf.mxu0  ;;  %v307_v19 = vpop.f32.mrf.mxu1 }
 0x119   :  { %v324_v20 = vmul.f32 0.70710677, %v229_v16  ;;  %v326_v21 = vmul.f32 0.70710677, %v306_v17  ;;  %v231_v22 = vadd.f32 %v230_v18, %v149_v15  ;;  %v308_v23 = vadd.f32 %v307_v19, %v157_v0 }
 0x11a   :  { %v234_v24 = vpop.f32.mrf.mxu0  ;;  %v311_v25 = vpop.f32.mrf.mxu1  ;;  %v316_v47 = vmul.f32 0.5, %v229_v16  ;;  %v318_v51 = vmul.f32 0.5, %v306_v17 }
 0x11b   :  { %701 = verf.f32 %v324_v20  ;;  %v235_v26 = vadd.f32 %v234_v24, %v145_v11  ;;  %v312_v27 = vadd.f32 %v311_v25, %v153_v12  ;;  %v325_v28 = vmul.f32 0.70710677, %v231_v22 }
 0x11c   :  { %703 = verf.f32 %v326_v21  ;;  %v236_v29 = vpop.f32.mrf.mxu0  ;;  %v313_v30 = vpop.f32.mrf.mxu1  ;;  %v327_v31 = vmul.f32 0.70710677, %v308_v23  ;;  %v317_v44 = vmul.f32 0.5, %v231_v22  ;;  %v319_v48 = vmul.f32 0.5, %v308_v23 }
 0x11d   :  { %v328_v32 = vmul.f32 0.70710677, %v235_v26  ;;  %705 = verf.f32 %v325_v28  ;;  %v330_v33 = vmul.f32 0.70710677, %v312_v27  ;;  %v237_v34 = vadd.f32 %v236_v29, %v149_v15 }
 0x11e   :  { %v314_v35 = vadd.f32 %v313_v30, %v157_v0  ;;  %707 = verf.f32 %v327_v31  ;;  %v320_v62 = vmul.f32 0.5, %v235_v26  ;;  %v322_v2 = vmul.f32 0.5, %v312_v27 }
 0x11f   :  { %709 = verf.f32 %v328_v32  ;;  %v329_v36 = vmul.f32 0.70710677, %v237_v34  ;;  %v321_v59 = vmul.f32 0.5, %v237_v34 }
 0x120   :  { %711 = verf.f32 %v330_v33  ;;  %v331_v37 = vmul.f32 0.70710677, %v314_v35  ;;  %v323_v63 = vmul.f32 0.5, %v314_v35 }
 0x121   :  { %713 = verf.f32 %v329_v36 }
 0x122   :  { %715 = verf.f32 %v331_v37 }
 0x128   :  { %v702_v38 = vpop.eup %701 }
 0x129   :  { %v704_v39 = vpop.eup %703  ;;  %v340_v41 = vadd.f32 1.0, %v702_v38 }
 0x12a   :  { %v706_v40 = vpop.eup %705  ;;  %v342_v43 = vadd.f32 1.0, %v704_v39 }
 0x12b   :  { %v708_v42 = vpop.eup %707  ;;  %v341_v45 = vadd.f32 1.0, %v706_v40  ;;  %v348_v54 = vmul.f32 %v340_v41, %v316_v47 }
 0x12c   :  { %v710_v46 = vpop.eup %709  ;;  %v343_v49 = vadd.f32 1.0, %v708_v42  ;;  %v350_v58 = vmul.f32 %v342_v43, %v318_v51 }
 0x12d   :  { %v712_v50 = vpop.eup %711  ;;  %v349_v52 = vmul.f32 %v341_v45, %v317_v44  ;;  %v344_v56 = vadd.f32 1.0, %v710_v46 }
 0x12e   :  { %v714_v53 = vpop.eup %713  ;;  %v351_v55 = vmul.f32 %v343_v49, %v319_v48  ;;  %v346_v61 = vadd.f32 1.0, %v712_v50 }
 0x12f   :  { %v716_v57 = vpop.eup %715  ;;  %484 = vmatprep.mubr.f32.mxu0 %v349_v52  ;;  %v345_v60 = vadd.f32 1.0, %v714_v53  ;;  %v352_v5 = vmul.f32 %v344_v56, %v320_v62 }
 0x130   :  { %559 = vmatprep.mubr.f32.mxu1 %v351_v55  ;;  %485 = vmatmul.mubr.f32.vlgmr.msra.gmra.mxu0 %v348_v54  ;;  %v347_v1 = vadd.f32 1.0, %v716_v57  ;;  %v354_v6 = vmul.f32 %v346_v61, %v322_v2 }
 0x131   :  { %560 = vmatmul.mubr.f32.vlgmr.msra.gmra.mxu1 %v350_v58  ;;  %v353_v3 = vmul.f32 %v345_v60, %v321_v59 }
 0x132   :  { %v355_v4 = vmul.f32 %v347_v1, %v323_v63 }
 0x133   :  { %489 = vmatprep.mubr.f32.mxu0 %v353_v3 }
 0x134   :  { %564 = vmatprep.mubr.f32.mxu1 %v355_v4  ;;  %490 = vmatmul.mubr.f32.gmra.mxu0 %v352_v5 }
 0x135   :  { %565 = vmatmul.mubr.f32.gmra.mxu1 %v354_v6 }
 0x1f0   :  { %v647_v7 = vpop.f32.mrf.mxu0 }
 0x1f1   :  { %v685_v8 = vpop.f32.mrf.mxu1 }
 0x1f2   :  { %v648_v9 = vpop.f32.mrf.mxu0 }
 0x1f3   :  { %v649_v10 = vadd.f32 %v648_v9, %v647_v7  ;;  %v686_v11 = vpop.f32.mrf.mxu1 }
 0x1f4   :  { %v687_v12 = vadd.f32 %v686_v11, %v685_v8  ;;  %v650_v13 = vpop.f32.mrf.mxu0 }
 0x1f5   :  { %v688_v15 = vpop.f32.mrf.mxu1 }
 0x1f6   :  { %v562_v0 = vadd.f32 %v687_v12, %v649_v10  ;;  %v651_v16 = vpop.f32.mrf.mxu0 }
 0x1f7   :  { %v652_v17 = vadd.f32 %v651_v16, %v650_v13  ;;  %v689_v18 = vpop.f32.mrf.mxu1 }
 0x1f8   :  { %v581_v19 = vadd.f32 %v614_v14, %v562_v0  ;;  %v690_v20 = vadd.f32 %v689_v18, %v688_v15 }
 0x1fa   :  { %583 = vst [vmem:[#allocation10] sm:$0xff] %v581_v19  ;;  %v567_v21 = vadd.f32 %v690_v20, %v652_v17 }
 0x1fc   :  { %v582_v22 = vadd.f32 %v614_v14, %v567_v21 }
 0x1fe   :  { %584 = vst [vmem:[#allocation10 + $0x8] sm:$0xff] %v582_v22 }
 0x1ff   :  { %808 = shalt.err (!%p805_p10)
}
 0x200   :  { %606 = dma.vmem_to_hbm [thread:$0]  %s601_s16, 256, %s901_s5, [#allocation4], %s829_s28, %s829_s28, %s830_s29  }
 0x201   :  { %823 = dma.done.wait [#allocation4], 256  }
 0x202   :  { %824 = vsyncadd [#allocation4], 4294967040 }
 0x203   :  { %610 = vsyncpa [#allocation3], 1 }
 0x204   :  { %611 = vsyncpa [#allocation6], 1 }
 0x205   :  { %612 = vsyncpa [#allocation9], 1 }
 0x206   :  { %613 = vsyncpa [#allocation4], 1 }

</bundles_post_ra>
